<compile_context>
chip_gen: v5e
topology: v5e:2x2
jax: 0.10.0
libtpu: 0.0.40
codegen_flags: <defaults>
</compile_context>

<pallas_src>
import functools

import jax
import jax.numpy as jnp
from jax.experimental import pallas as pl
from jax.experimental.pallas import tpu as pltpu

_LANES = 128
_SUBLANES = 8


def _round_up(a, b):
    return -(-a // b) * b


def _num_tensorcores():
    """2 TensorCores per chip on v7x; 1 on v5e/v6e (and anything unknown)."""
    try:
        kind = jax.devices()[0].device_kind.lower()
    except Exception:
        return 1
    return 2 if "7" in kind else 1


def _sum_kernel(f, valid_rows, rem_lanes, tm, kacc, x_ref, o_ref):
    """Accumulate sum(f(x)) over valid elements into a per-core (1, kacc*8, 128) block.

    valid_rows = n // 128 (full lanes-wide rows), rem_lanes = n % 128; both are
    static Python ints.  All in-kernel index math is in *row* units so int32 is
    safe for any realistic input size.
    """
    c = pl.program_id(0)            # core-parallel axis (v7x only; size 1 elsewhere)
    i = pl.program_id(1)            # sequential reduction axis
    nsteps = pl.num_programs(1)
    tile_idx = c * nsteps + i       # global row-block index
    tile_row0 = tile_idx * tm       # first (global) row of this tile

    @pl.when(i == 0)
    def _():
        o_ref[...] = jnp.zeros_like(o_ref)

    x = x_ref[...].astype(jnp.float32)   # cast in-kernel (halves HBM traffic for bf16)
    fx = f(x)

    rows_grp = _SUBLANES * kacc
    # Number of fully-valid rows inside this tile (may be <= 0 for duplicated
    # / fully-past-the-end tiles, in which case everything is masked out).
    local_full = valid_rows - tile_row0

    @pl.when(local_full >= tm)
    def _():
        # Interior tile: no padding -> unmasked VPU adds into kacc parallel
        # (8,128) accumulator chains.
        o_ref[...] += fx.reshape(1, tm // rows_grp, rows_grp, _LANES).sum(axis=1)

    @pl.when(local_full < tm)
    def _():
        # Tail (or duplicated) tile: mask from a row iota vs. the scalar
        # full-row count, plus one lane compare for the single ragged row.
        # Out-of-bounds block rows contain garbage -> must use select, not
        # multiply-by-mask.
        row = jax.lax.broadcasted_iota(jnp.int32, (tm, _LANES), 0)
        mask = row < local_full
        if rem_lanes:   # static: only emit the lane compare when n % 128 != 0
            lane = jax.lax.broadcasted_iota(jnp.int32, (tm, _LANES), 1)
            mask = mask | ((row == local_full) & (lane < rem_lanes))
        fxm = jnp.where(mask, fx, 0.0)
        o_ref[...] += fxm.reshape(1, tm // rows_grp, rows_grp, _LANES).sum(axis=1)


def _masked_sum(f, x2d, valid_rows, rem_lanes, tm, kacc, ncores, steps,
                transcendentals, in_bytes):
    rows_data = x2d.shape[0]
    tiles_needed = -(-rows_data // tm)
    last_block = tiles_needed - 1

    # Clamp so no grid step points at a block that starts past the array end
    # (duplicated tiles are fully masked in-kernel and contribute 0).
    def in_map(c, i):
        return (jnp.minimum(c * steps + i, last_block), 0)

    if ncores == 2:
        dims = (getattr(pltpu, "CORE_PARALLEL", "parallel"),
                getattr(pltpu, "ARBITRARY", "arbitrary"))
    else:
        dims = ("arbitrary", "arbitrary")

    kern = functools.partial(_sum_kernel, f, valid_rows, rem_lanes, tm, kacc)
    out_rows = kacc * _SUBLANES

    out = pl.pallas_call(
        kern,
        out_shape=jax.ShapeDtypeStruct((ncores, out_rows, _LANES), jnp.float32),
        grid_spec=pltpu.PrefetchScalarGridSpec(
            num_scalar_prefetch=0,
            grid=(ncores, steps),
            in_specs=[pl.BlockSpec((tm, _LANES), in_map)],
            out_specs=pl.BlockSpec((1, out_rows, _LANES), lambda c, i: (c, 0, 0)),
        ),
        compiler_params=pltpu.CompilerParams(
            dimension_semantics=dims,
            vmem_limit_bytes=32 * 1024 * 1024),
        cost_estimate=pl.CostEstimate(
            flops=4 * (valid_rows * _LANES + rem_lanes),
            transcendentals=transcendentals,
            bytes_accessed=in_bytes + ncores * out_rows * _LANES * 4),
    )(x2d)
    # Tiny (ncores, kacc*8, 128) final reduce done outside the kernel.
    return jnp.sum(out)


def _make_elementwise(gan_type, target_is_real, is_disc,
                      real_label_val, fake_label_val):
    """Return (f, sign, transcendentals_per_elem) such that loss = sign * mean(f(x)).

    Closure constants are Python floats so the kernel captures no traced values.
    """
    if gan_type == 'vanilla':
        t = float(real_label_val if target_is_real else fake_label_val)
        # BCEWithLogitsLoss with constant target t: max(x,0) - x*t + log1p(exp(-|x|))
        f = lambda x: jnp.maximum(x, 0.0) - x * t + jnp.log1p(jnp.exp(-jnp.abs(x)))
        return f, 1.0, 2
    if gan_type == 'lsgan':
        t = float(real_label_val if target_is_real else fake_label_val)
        return (lambda x: (x - t) * (x - t)), 1.0, 0
    if gan_type == 'wgan':
        return (lambda x: x), (-1.0 if target_is_real else 1.0), 0
    if gan_type == 'wgan_softplus':
        s = -1.0 if target_is_real else 1.0
        # softplus(s*x) = max(s*x, 0) + log1p(exp(-|x|))   (numerically stable)
        return (lambda x: jnp.maximum(s * x, 0.0) + jnp.log1p(jnp.exp(-jnp.abs(x)))), 1.0, 2
    if gan_type == 'hinge':
        if is_disc:
            s = -1.0 if target_is_real else 1.0
            return (lambda x: jnp.maximum(1.0 + s * x, 0.0)), 1.0, 0
        return (lambda x: x), -1.0, 0
    raise NotImplementedError(f'GAN type {gan_type} is not implemented.')


def gan_loss_pallas(x, gan_type, target_is_real, is_disc=False,
                    real_label_val=1.0, fake_label_val=0.0, loss_weight=1.0,
                    tm=None):
    """Forward pass of GANLoss. Returns a scalar float32 (same semantics as torch)."""
    n = int(x.size)
    itemsize = jnp.dtype(x.dtype).itemsize
    valid_rows, rem_lanes = divmod(n, _LANES)
    rows_data = valid_rows + (1 if rem_lanes else 0)

    # Row tile targeting ~2 MiB of input per DMA block (double-buffered plus
    # f32 temporaries stays under the 32 MiB scoped-VMEM limit requested above,
    # safe on v5e/v6e/v7x).  Shrunk for tiny inputs.
    if tm is None:
        tm = (2 * 1024 * 1024) // (_LANES * itemsize)
    tm = max(_SUBLANES, min(_round_up(tm, _SUBLANES), _round_up(rows_data, _SUBLANES)))

    # Number of independent (8,128) partial accumulator chains per core.
    kacc = 1
    for k in (8, 4, 2):
        if (tm // _SUBLANES) % k == 0:
            kacc = k
            break

    tiles_needed = -(-rows_data // tm)
    ncores = min(_num_tensorcores(), tiles_needed)   # 2 only on v7x
    steps = -(-tiles_needed // ncores)

    flat = jnp.ravel(x)                      # native dtype; cast happens in-kernel
    pad = rows_data * _LANES - n             # at most 127 elements; usually zero
    if pad:
        flat = jnp.pad(flat, (0, pad))
    x2d = flat.reshape(rows_data, _LANES)

    f, sign, trans_per_elem = _make_elementwise(gan_type, target_is_real, is_disc,
                                                real_label_val, fake_label_val)
    total_sum = _masked_sum(f, x2d, valid_rows, rem_lanes, tm, kacc, ncores, steps,
                            trans_per_elem * n, n * itemsize)

    scale = sign / float(n)
    if not is_disc:
        scale *= float(loss_weight)          # loss_weight only for generators
    return total_sum * jnp.float32(scale)


# ----------------------------- pure-JAX reference -----------------------------
def gan_loss_ref(x, gan_type, target_is_real, is_disc=False,
                 real_label_val=1.0, fake_label_val=0.0, loss_weight=1.0):
    x = x.astype(jnp.float32)
    t = jnp.float32(real_label_val if target_is_real else fake_label_val)
    if gan_type == 'vanilla':
        loss = jnp.mean(jnp.maximum(x, 0.0) - x * t + jnp.log1p(jnp.exp(-jnp.abs(x))))
    elif gan_type == 'lsgan':
        loss = jnp.mean((x - t) ** 2)
    elif gan_type == 'wgan':
        loss = -jnp.mean(x) if target_is_real else jnp.mean(x)
    elif gan_type == 'wgan_softplus':
        loss = jnp.mean(jax.nn.softplus(-x)) if target_is_real else jnp.mean(jax.nn.softplus(x))
    elif gan_type == 'hinge':
        if is_disc:
            xi = -x if target_is_real else x
            loss = jnp.mean(jax.nn.relu(1.0 + xi))
        else:
            loss = -jnp.mean(x)
    else:
        raise NotImplementedError
    return loss if is_disc else loss * jnp.float32(loss_weight)


if __name__ == "__main__":
    key = jax.random.PRNGKey(0)
    k1, k2, k3 = jax.random.split(key, 3)

    # (input, tm) pairs chosen to exercise: exact-multiple single tile
    # (interior branch), ragged tail with lane mask + minimal pad, explicit
    # small tm -> multi-tile with partially-OOB edge block, and a bf16 input.
    x_a = jax.random.normal(k1, (2, 4, 16, 16), dtype=jnp.float32)   # 2048 elems
    x_b = jax.random.normal(k2, (2, 3, 15, 17), dtype=jnp.float32)   # 1530 elems (ragged)
    x_c = jax.random.normal(k3, (2, 4, 33, 16), dtype=jnp.float32)   # 4224 elems
    x_d = x_a.astype(jnp.bfloat16)
    test_inputs = [(x_a, 2048), (x_b, None), (x_c, 8), (x_d, None)]

    cases = [
        ('vanilla',       True,  False),
        ('vanilla',       False, True),
        ('lsgan',         True,  False),
        ('lsgan',         False, True),
        ('wgan',          True,  True),
        ('wgan',          False, False),
        ('wgan_softplus', False, False),
        ('wgan_softplus', True,  True),
        ('hinge',         True,  True),
        ('hinge',         False, True),
        ('hinge',         True,  False),
    ]
    loss_weight = 0.5

    for x, tm in test_inputs:
        for gan_type, target_is_real, is_disc in cases:
            got = gan_loss_pallas(x, gan_type, target_is_real, is_disc=is_disc,
                                  loss_weight=loss_weight, tm=tm)
            got = jax.block_until_ready(got)
            want = gan_loss_ref(x, gan_type, target_is_real, is_disc=is_disc,
                                loss_weight=loss_weight)
            assert jnp.allclose(got, want, rtol=1e-5, atol=1e-5), (
                f"{gan_type} real={target_is_real} is_disc={is_disc} "
                f"shape={x.shape} dtype={x.dtype}: {got} vs {want}")

    print("KERNEL_OK")
</pallas_src>

<mosaic_0001>
module attributes {stable_mosaic.version = 11 : i64} {
  func.func @_sum_kernel(%arg0: i32, %arg1: i32, %arg2: memref<16x128xf32, #tpu.memory_space<vmem>>, %arg3: memref<1x16x128xf32, #tpu.memory_space<vmem>>) attributes {dimension_semantics = [#tpu.dimension_semantics<arbitrary>, #tpu.dimension_semantics<arbitrary>], iteration_bounds = array<i64: 1, 1>, scalar_prefetch = 0 : i64, scratch_operands = 0 : i64, tpu.core_type = #tpu.core_type<tc>, window_params = [{transform_indices = @transform_0, window_bounds = array<i64: 16, 128>}, {transform_indices = @transform_1, window_bounds = array<i64: 1, 16, 128>}]} {
    %c1_i32 = arith.constant 1 : i32
    %0 = arith.muli %arg0, %c1_i32 : i32
    %1 = arith.addi %0, %arg1 : i32
    %c16_i32 = arith.constant 16 : i32
    %2 = arith.muli %1, %c16_i32 : i32
    %c0_i32 = arith.constant 0 : i32
    %3 = arith.cmpi eq, %arg1, %c0_i32 : i32
    %4 = arith.extui %3 : i1 to i32
    %c0_i32_0 = arith.constant 0 : i32
    %5 = arith.cmpi ne, %4, %c0_i32_0 : i32
    scf.if %5 {
      %cst_9 = arith.constant 0.000000e+00 : f32
      %25 = vector.broadcast %cst_9 : f32 to vector<1x16x128xf32>
      %c0_10 = arith.constant 0 : index
      %c0_11 = arith.constant 0 : index
      %c0_12 = arith.constant 0 : index
      %26 = vector.load %arg3[%c0_10, %c0_11, %c0_12] : memref<1x16x128xf32, #tpu.memory_space<vmem>>, vector<1x16x128xf32>
      tpu.vector_store %arg3[%c0_10, %c0_11, %c0_12], %25 {strides = array<i32>} : memref<1x16x128xf32, #tpu.memory_space<vmem>>, vector<1x16x128xf32>,
    } else {
    }
    %c0 = arith.constant 0 : index
    %c0_1 = arith.constant 0 : index
    %6 = vector.load %arg2[%c0, %c0_1] : memref<16x128xf32, #tpu.memory_space<vmem>>, vector<16x128xf32>
    %cst = arith.constant 0.000000e+00 : f32
    %7 = vector.broadcast %cst : f32 to vector<16x128xf32>
    %8 = arith.maximumf %6, %7 : vector<16x128xf32>
    %cst_2 = arith.constant 1.000000e+00 : f32
    %9 = vector.broadcast %cst_2 : f32 to vector<16x128xf32>
    %10 = arith.mulf %6, %9 : vector<16x128xf32>
    %11 = arith.subf %8, %10 : vector<16x128xf32>
    %12 = math.absf %6 : vector<16x128xf32>
    %cst_3 = arith.constant 0.000000e+00 : f32
    %13 = vector.broadcast %cst_3 : f32 to vector<16x128xf32>
    %14 = arith.subf %13, %12 : vector<16x128xf32>
    %15 = math.exp %14 : vector<16x128xf32>
    %16 = math.log1p %15 : vector<16x128xf32>
    %17 = arith.addf %11, %16 : vector<16x128xf32>
    %c16_i32_4 = arith.constant 16 : i32
    %18 = arith.subi %c16_i32_4, %2 : i32
    %c16_i32_5 = arith.constant 16 : i32
    %19 = arith.cmpi sge, %18, %c16_i32_5 : i32
    %20 = arith.extui %19 : i1 to i32
    %c0_i32_6 = arith.constant 0 : i32
    %21 = arith.cmpi ne, %20, %c0_i32_6 : i32
    scf.if %21 {
      %c0_9 = arith.constant 0 : index
      %c0_10 = arith.constant 0 : index
      %c0_11 = arith.constant 0 : index
      %25 = vector.load %arg3[%c0_9, %c0_10, %c0_11] : memref<1x16x128xf32, #tpu.memory_space<vmem>>, vector<1x16x128xf32>
      %26 = vector.shape_cast %17 : vector<16x128xf32> to vector<1x1x16x128xf32>
      %cst_12 = arith.constant dense<0.000000e+00> : vector<1x16x128xf32>
      %27 = vector.multi_reduction <add>, %26, %cst_12 [1] : vector<1x1x16x128xf32> to vector<1x16x128xf32>
      %28 = arith.addf %25, %27 : vector<1x16x128xf32>
      %c0_13 = arith.constant 0 : index
      %c0_14 = arith.constant 0 : index
      %c0_15 = arith.constant 0 : index
      %29 = vector.load %arg3[%c0_13, %c0_14, %c0_15] : memref<1x16x128xf32, #tpu.memory_space<vmem>>, vector<1x16x128xf32>
      tpu.vector_store %arg3[%c0_13, %c0_14, %c0_15], %28 {strides = array<i32>} : memref<1x16x128xf32, #tpu.memory_space<vmem>>, vector<1x16x128xf32>,
    } else {
    }
    %c16_i32_7 = arith.constant 16 : i32
    %22 = arith.cmpi slt, %18, %c16_i32_7 : i32
    %23 = arith.extui %22 : i1 to i32
    %c0_i32_8 = arith.constant 0 : i32
    %24 = arith.cmpi ne, %23, %c0_i32_8 : i32
    scf.if %24 {
      %25 = tpu.iota {dimensions = array<i32: 0>} : vector<16x128xi32>
      %26 = vector.broadcast %18 : i32 to vector<16x128xi32>
      %27 = arith.cmpi slt, %25, %26 : vector<16x128xi32>
      %cst_9 = arith.constant 0.000000e+00 : f32
      %28 = vector.broadcast %cst_9 : f32 to vector<16x128xf32>
      %29 = arith.select %27, %17, %28 : vector<16x128xi1>, vector<16x128xf32>
      %c0_10 = arith.constant 0 : index
      %c0_11 = arith.constant 0 : index
      %c0_12 = arith.constant 0 : index
      %30 = vector.load %arg3[%c0_10, %c0_11, %c0_12] : memref<1x16x128xf32, #tpu.memory_space<vmem>>, vector<1x16x128xf32>
      %31 = vector.shape_cast %29 : vector<16x128xf32> to vector<1x1x16x128xf32>
      %cst_13 = arith.constant dense<0.000000e+00> : vector<1x16x128xf32>
      %32 = vector.multi_reduction <add>, %31, %cst_13 [1] : vector<1x1x16x128xf32> to vector<1x16x128xf32>
      %33 = arith.addf %30, %32 : vector<1x16x128xf32>
      %c0_14 = arith.constant 0 : index
      %c0_15 = arith.constant 0 : index
      %c0_16 = arith.constant 0 : index
      %34 = vector.load %arg3[%c0_14, %c0_15, %c0_16] : memref<1x16x128xf32, #tpu.memory_space<vmem>>, vector<1x16x128xf32>
      tpu.vector_store %arg3[%c0_14, %c0_15, %c0_16], %33 {strides = array<i32>} : memref<1x16x128xf32, #tpu.memory_space<vmem>>, vector<1x16x128xf32>,
    } else {
    }
    return
  }
  func.func @transform_0(%arg0: i32, %arg1: i32) -> (i32, i32) {
    %c1_i32 = arith.constant 1 : i32
    %0 = arith.muli %arg0, %c1_i32 : i32
    %1 = arith.addi %0, %arg1 : i32
    %c0_i32 = arith.constant 0 : i32
    %2 = arith.minsi %1, %c0_i32 : i32
    %c0_i32_0 = arith.constant 0 : i32
    %c0_i32_1 = arith.constant 0 : i32
    return %2, %c0_i32_0 : i32, i32
  }
  func.func @transform_1(%arg0: i32, %arg1: i32) -> (i32, i32, i32) {
    %c0_i32 = arith.constant 0 : i32
    %c0_i32_0 = arith.constant 0 : i32
    %c0_i32_1 = arith.constant 0 : i32
    return %arg0, %c0_i32, %c0_i32_0 : i32, i32, i32
  }
}

</mosaic_0001>

<bundles_post_ra>
// kernel: tpu_custom_call.1
= control target key start
LH: loop header
LB: loop body
LE: loop exit
PB: predicated region body
PF: predicated region fallthrough
CT: control target
= control target key end

     0   :  { %6 = vsyncpa [#allocation3], 0  ;;  %s222_s0 = inlined_call_operand.hbm [shape: f32[16,128], index: 0, kind: input, shape index: {}]   ;;  %s223_s1 = inlined_call_operand.hbm [shape: f32[1,16,128], index: 1, kind: output, shape index: {}]  }
   0x1   :  { %7 = vsyncpa [#allocation4], 0  ;;  %s18_s8 = sshll.u32 %s222_s0, 4  ;;  %s196_s9 = smov [#allocation2]   ;;  %s19_s8 = int_to_ptr.hbm [resolvable:$true] %s18_s8 }
   0x2   :  { %s20_s10 = sshll.u32 %s196_s9, 4  ;;  %s197_s11 = smov 128   ;;  %s21_s10 = int_to_ptr.vmem [resolvable:$true] %s20_s10 }
   0x3   :  { %s198_s12 = smov 8  }
   0x4   :  { %26 = dma.hbm_to_vmem [thread:$0]  %s19_s8, 256, %s21_s10, [#allocation3], %s197_s11, %s197_s11, %s198_s12  }
   0x5   :  { %192 = dma.done.wait [#allocation3], 256  }
   0x6   :  { %193 = vsyncadd [#allocation3], 4294967040  ;;  %v43_v0 = vld [vmem:[#allocation2] sm:$0xff]  ;;  %v44_v1 = vld [vmem:[#allocation2 + $0x8] sm:$0xff]  ;;  %s199_s0 = smov [#allocation5]   ;;  %s116_s16 = sshll.u32 %s223_s1, 4  ;;  %s117_s16 = int_to_ptr.hbm [resolvable:$true] %s116_s16 }
   0x7   :  { %v49_v2 = vand.u32 2147483647, %v43_v0  ;;  %v50_v3 = vand.u32 2147483647, %v44_v1  ;;  %v45_v15 = vmax.f32 %v43_v0, 0.0  ;;  %v46_v18 = vmax.f32 %v44_v1, 0.0 }
   0x8   :  { %s114_s13 = sshll.u32 %s199_s0, 4  ;;  %s115_s13 = int_to_ptr.vmem [resolvable:$true] %s114_s13 }
   0x9   :  { %v51_v4 = vsub.f32 0.0, %v49_v2  ;;  %v52_v5 = vsub.f32 0.0, %v50_v3  ;;  %v47_v22 = vsub.f32 %v45_v15, %v43_v0  ;;  %v48_v26 = vsub.f32 %v46_v18, %v44_v1 }
   0xb   :  { %v53_v6 = vmul.f32 1.442695, %v51_v4  ;;  %v55_v7 = vmul.f32 1.442695, %v52_v5 }
   0xd   :  { %136 = vpow2.f32 %v53_v6 }
   0xe   :  { %138 = vpow2.f32 %v55_v7 }
  0x13   :  { %v137_v8 = vpop.eup %136 }
  0x14   :  { %v139_v9 = vpop.eup %138  ;;  %v57_v10 = vadd.f32 1.0, %v137_v8  ;;  %v60_v11 = vmul.f32 -0.5, %v137_v8  ;;  %v63_v16 = vand.u32 2147483647, %v137_v8 }
  0x15   :  { %v66_v12 = vadd.f32 1.0, %v139_v9  ;;  %v69_v13 = vmul.f32 -0.5, %v139_v9  ;;  %v72_v19 = vand.u32 2147483647, %v139_v9 }
  0x16   :  { %140 = vlog2.f32 %v57_v10  ;;  %v61_v14 = vadd.f32 1.0, %v60_v11  ;;  %vm64_vm0 = vcmp.lt.f32.partialorder %v63_v16, 0.0004427343 }
  0x17   :  { %142 = vlog2.f32 %v66_v12  ;;  %v70_v17 = vadd.f32 1.0, %v69_v13  ;;  %vm73_vm1 = vcmp.lt.f32.partialorder %v72_v19, 0.0004427343 }
  0x18   :  { %v62_v20 = vmul.f32 %v137_v8, %v61_v14 }
  0x19   :  { %v71_v23 = vmul.f32 %v139_v9, %v70_v17 }
  0x1c   :  { %v141_v21 = vpop.eup %140 }
  0x1d   :  { %v143_v24 = vpop.eup %142  ;;  %v59_v25 = vmul.f32 0.6931472, %v141_v21 }
  0x1e   :  { %v68_v27 = vmul.f32 0.6931472, %v143_v24 }
  0x1f   :  { %v65_v28 = vsel %vm64_vm0, %v62_v20, %v59_v25 }
  0x20   :  { %v75_v29 = vadd.f32 %v65_v28, %v47_v22  ;;  %v74_v30 = vsel %vm73_vm1, %v71_v23, %v68_v27 }
  0x21   :  { %v76_v31 = vadd.f32 %v74_v30, %v48_v26 }
  0x22   :  { %88 = vst [vmem:[#allocation5] sm:$0xff] %v75_v29 }
  0x23   :  { %89 = vst [vmem:[#allocation5 + $0x8] sm:$0xff] %v76_v31 }
  0x24   :  { %122 = dma.vmem_to_hbm [thread:$0]  %s115_s13, 256, %s117_s16, [#allocation4], %s197_s11, %s197_s11, %s198_s12  }
  0x25   :  { %194 = dma.done.wait [#allocation4], 256  }
  0x26   :  { %195 = vsyncadd [#allocation4], 4294967040 }
  0x27   :  { %127 = vsyncpa [#allocation3], 1 }
  0x28   :  { %128 = vsyncpa [#allocation4], 1 }

</bundles_post_ra>
